<compile_context>
chip_gen: v7x
topology: tpu7x:2x2x1
jax: 0.10.0
libtpu: 0.0.40
codegen_flags: <defaults>
</compile_context>

<pallas_src>
import jax
import jax.numpy as jnp
from jax.experimental import pallas as pl
from jax.experimental.pallas import tpu as pltpu


def _round_up(x: int, m: int) -> int:
    return ((x + m - 1) // m) * m


def _cdiv(a: int, b: int) -> int:
    return (a + b - 1) // b


def _mlp_kernel(x_ref, w1_ref, b1_ref, w2_ref, b2_ref, w3_ref, b3_ref, o_ref):
    # x_ref: (TR, P*d_in) f32 tile; weights bf16 (block-diagonal); biases f32 rows.
    # Cast to bf16 here (VPU pack hides under DMA/MXU slack) -> MXU with f32 accumulate.
    x = x_ref[...].astype(jnp.bfloat16)
    h1 = jnp.dot(x, w1_ref[...], preferred_element_type=jnp.float32)
    h1 = jnp.maximum(h1 + b1_ref[...], 0.0)
    h2 = jnp.dot(h1.astype(jnp.bfloat16), w2_ref[...],
                 preferred_element_type=jnp.float32)
    h2 = jnp.maximum(h2 + b2_ref[...], 0.0)
    z = jnp.dot(h2.astype(jnp.bfloat16), w3_ref[...],
                preferred_element_type=jnp.float32)
    o_ref[...] = jax.nn.sigmoid(z + b3_ref[...])


def _pick_pack(batch: int, p_max: int = 8) -> int:
    # Largest P <= p_max that divides the batch (B is static at trace time).
    for p in (8, 4, 2):
        if p <= p_max and batch % p == 0:
            return p
    return 1


@jax.jit
def autoencoder_in_forward(x, w1, b1, w2, b2, w3, b3):
    """Pallas forward pass of AutoencoderIn.

    x: (B, samples, features) float32; weights stored (in, out); biases (1, out).
    returns: (B, out) float32
    """
    B = x.shape[0]
    d_in = x.shape[1] * x.shape[2]
    h1_dim, h2_dim, d_out = w1.shape[1], w2.shape[1], w3.shape[1]

    x2d = x.reshape(B, d_in)                         # flatten(start_dim=1), metadata only

    # ---- P-way sample packing (lane-dense rows, wider output) -------------------
    P = _pick_pack(B)
    R = B // P
    xp = x2d.reshape(R, P * d_in)                    # contiguous -> metadata only

    bf = jnp.bfloat16
    eye = jnp.eye(P, dtype=jnp.float32)
    w1p = jnp.kron(eye, w1).astype(bf)               # (P*d_in, P*h1) block-diagonal
    w2p = jnp.kron(eye, w2).astype(bf)
    w3p = jnp.kron(eye, w3).astype(bf)
    b1p = jnp.tile(b1.reshape(1, -1), (1, P))        # f32 (1, P*h1)
    b2p = jnp.tile(b2.reshape(1, -1), (1, P))
    b3p = jnp.tile(b3.reshape(1, -1), (1, P))

    din_p, h1_p, h2_p, dout_p = P * d_in, P * h1_dim, P * h2_dim, P * d_out

    # ---- row tiling over packed rows ---------------------------------------------
    # Keep the x tile within a ~4 MiB budget (double-buffered -> ~8 MiB), cap 1024 rows.
    tr_cap = max(8, min(1024, ((4 * 1024 * 1024) // (4 * din_p)) // 8 * 8))
    if R <= min(512, tr_cap):
        TR = R          # single full block (block dims == array dims: no alignment needed)
    else:
        # >=4 steps so both v7x TensorCores get work and the pipeline can overlap.
        TR = min(tr_cap, _round_up(_cdiv(R, 4), 8))
    nb = _cdiv(R, TR)
    R_pad = nb * TR     # only the OUTPUT allocation is padded; x stays unpadded.

    resident = lambda a: pl.BlockSpec(a.shape, lambda i: (0, 0))

    flops = 2 * R_pad * (din_p * h1_p + h1_p * h2_p + h2_p * dout_p)
    bytes_accessed = (
        xp.size * 4
        + (w1p.size + w2p.size + w3p.size) * 2
        + (b1p.size + b2p.size + b3p.size) * 4
        + R_pad * dout_p * 4
    )
    cost = pl.CostEstimate(flops=flops, transcendentals=R_pad * dout_p,
                           bytes_accessed=bytes_accessed)

    out = pl.pallas_call(
        _mlp_kernel,
        out_shape=jax.ShapeDtypeStruct((R_pad, dout_p), jnp.float32),
        grid=(nb,),
        in_specs=[
            pl.BlockSpec((TR, din_p), lambda i: (i, 0)),   # batch-tiled f32 input
            resident(w1p), resident(b1p),                  # tiny weights: VMEM resident
            resident(w2p), resident(b2p),
            resident(w3p), resident(b3p),
        ],
        out_specs=pl.BlockSpec((TR, dout_p), lambda i: (i, 0)),
        compiler_params=pltpu.CompilerParams(
            dimension_semantics=("parallel",),
            vmem_limit_bytes=16 * 1024 * 1024,
        ),
        cost_estimate=cost,
    )(xp, w1p, b1p, w2p, b2p, w3p, b3p)

    # Drop padded garbage rows (partial last block), then unpack to (B, out).
    return out[:R].reshape(B, d_out)


def init_params(key, samples, features, out):
    """Deterministic init mimicking torch.nn.Linear defaults U(-1/sqrt(fan_in), +...)."""
    d_in = samples * features
    h1 = int(d_in - (d_in - out) / 3)
    h2 = int(d_in - 2 * (d_in - out) / 3)

    def linear_init(k, fan_in, fan_out):
        kw, kb = jax.random.split(k)
        bound = 1.0 / jnp.sqrt(jnp.float32(fan_in))
        w = jax.random.uniform(kw, (fan_in, fan_out), jnp.float32, -bound, bound)
        b = jax.random.uniform(kb, (1, fan_out), jnp.float32, -bound, bound)
        return w, b

    k1, k2, k3 = jax.random.split(key, 3)
    w1, b1 = linear_init(k1, d_in, h1)
    w2, b2 = linear_init(k2, h1, h2)
    w3, b3 = linear_init(k3, h2, out)
    return (w1, b1, w2, b2, w3, b3), (h1, h2)


def reference_forward_f32(x, w1, b1, w2, b2, w3, b3):
    x2d = x.reshape(x.shape[0], -1)
    h1 = jnp.maximum(x2d @ w1 + b1, 0.0)
    h2 = jnp.maximum(h1 @ w2 + b2, 0.0)
    return jax.nn.sigmoid(h2 @ w3 + b3)


def reference_forward_bf16(x, w1, b1, w2, b2, w3, b3):
    # Mirrors the kernel's mixed-precision recipe (bf16 matmul inputs, f32 accumulate).
    bf = jnp.bfloat16
    x2d = x.reshape(x.shape[0], -1).astype(bf)
    h1 = jnp.maximum(
        jnp.dot(x2d, w1.astype(bf), preferred_element_type=jnp.float32) + b1, 0.0)
    h2 = jnp.maximum(
        jnp.dot(h1.astype(bf), w2.astype(bf), preferred_element_type=jnp.float32) + b2, 0.0)
    z = jnp.dot(h2.astype(bf), w3.astype(bf), preferred_element_type=jnp.float32) + b3
    return jax.nn.sigmoid(z)


if __name__ == "__main__":
    # samples=8, features=4, out=8 -> d_in=32, hidden_1=24, hidden_2=16
    samples, features, out_dim = 8, 4, 8
    key = jax.random.PRNGKey(0)
    kx, kp, kx2 = jax.random.split(key, 3)

    (w1, b1, w2, b2, w3, b3), (h1, h2) = init_params(kp, samples, features, out_dim)

    # Small batch: P=8 packing, single grid step.
    B = 16
    x = jax.random.normal(kx, (B, samples, features), jnp.float32)
    y = jax.block_until_ready(autoencoder_in_forward(x, w1, b1, w2, b2, w3, b3))
    assert y.shape == (B, out_dim)
    assert jnp.allclose(y, reference_forward_bf16(x, w1, b1, w2, b2, w3, b3),
                        atol=1e-4, rtol=1e-4)
    assert jnp.allclose(y, reference_forward_f32(x, w1, b1, w2, b2, w3, b3),
                        atol=3e-2, rtol=3e-2)

    # Larger batch: exercises multi-step grid, partial last input block, padded output.
    B2 = 4104
    x2 = jax.random.normal(kx2, (B2, samples, features), jnp.float32)
    y2 = jax.block_until_ready(autoencoder_in_forward(x2, w1, b1, w2, b2, w3, b3))
    assert y2.shape == (B2, out_dim)
    assert jnp.allclose(y2, reference_forward_bf16(x2, w1, b1, w2, b2, w3, b3),
                        atol=1e-4, rtol=1e-4)

    print("KERNEL_OK")
</pallas_src>

<mosaic_0001>
module attributes {stable_mosaic.version = 11 : i64} {
  func.func @_mlp_kernel(%arg0: i32, %arg1: memref<2x256xf32, #tpu.memory_space<vmem>>, %arg2: memref<256x192xbf16, #tpu.memory_space<vmem>>, %arg3: memref<1x192xf32, #tpu.memory_space<vmem>>, %arg4: memref<192x128xbf16, #tpu.memory_space<vmem>>, %arg5: memref<1x128xf32, #tpu.memory_space<vmem>>, %arg6: memref<128x64xbf16, #tpu.memory_space<vmem>>, %arg7: memref<1x64xf32, #tpu.memory_space<vmem>>, %arg8: memref<2x64xf32, #tpu.memory_space<vmem>>) attributes {dimension_semantics = [#tpu.dimension_semantics<parallel>], iteration_bounds = array<i64: 1>, scalar_prefetch = 0 : i64, scratch_operands = 0 : i64, tpu.core_type = #tpu.core_type<tc>, window_params = [{transform_indices = @transform_0, window_bounds = array<i64: 2, 256>}, {pipeline_mode = #tpu.pipeline_mode<synchronous>, transform_indices = @transform_1, window_bounds = array<i64: 256, 192>}, {pipeline_mode = #tpu.pipeline_mode<synchronous>, transform_indices = @transform_2, window_bounds = array<i64: 1, 192>}, {pipeline_mode = #tpu.pipeline_mode<synchronous>, transform_indices = @transform_3, window_bounds = array<i64: 192, 128>}, {pipeline_mode = #tpu.pipeline_mode<synchronous>, transform_indices = @transform_4, window_bounds = array<i64: 1, 128>}, {pipeline_mode = #tpu.pipeline_mode<synchronous>, transform_indices = @transform_5, window_bounds = array<i64: 128, 64>}, {pipeline_mode = #tpu.pipeline_mode<synchronous>, transform_indices = @transform_6, window_bounds = array<i64: 1, 64>}, {transform_indices = @transform_7, window_bounds = array<i64: 2, 64>}]} {
    %c0 = arith.constant 0 : index
    %c0_0 = arith.constant 0 : index
    %0 = vector.load %arg1[%c0, %c0_0] : memref<2x256xf32, #tpu.memory_space<vmem>>, vector<2x256xf32>
    %1 = arith.truncf %0 : vector<2x256xf32> to vector<2x256xbf16>
    %c0_1 = arith.constant 0 : index
    %c0_2 = arith.constant 0 : index
    %2 = vector.load %arg2[%c0_1, %c0_2] : memref<256x192xbf16, #tpu.memory_space<vmem>>, vector<256x192xbf16>
    %cst = arith.constant dense<0.000000e+00> : vector<2x192xf32>
    %3 = tpu.matmul %1, %2, %cst {dimension_numbers = #tpu.dot_dimension_numbers<[1], [0], [0], [1], [0, 0, 1, 1], [], []>} : vector<2x256xbf16>, vector<256x192xbf16>, vector<2x192xf32> -> vector<2x192xf32>
    %c0_3 = arith.constant 0 : index
    %c0_4 = arith.constant 0 : index
    %4 = vector.load %arg3[%c0_3, %c0_4] : memref<1x192xf32, #tpu.memory_space<vmem>>, vector<1x192xf32>
    %5 = vector.broadcast %4 : vector<1x192xf32> to vector<2x192xf32>
    %6 = arith.addf %3, %5 : vector<2x192xf32>
    %cst_5 = arith.constant 0.000000e+00 : f32
    %7 = vector.broadcast %cst_5 : f32 to vector<2x192xf32>
    %8 = arith.maximumf %6, %7 : vector<2x192xf32>
    %9 = arith.truncf %8 : vector<2x192xf32> to vector<2x192xbf16>
    %c0_6 = arith.constant 0 : index
    %c0_7 = arith.constant 0 : index
    %10 = vector.load %arg4[%c0_6, %c0_7] : memref<192x128xbf16, #tpu.memory_space<vmem>>, vector<192x128xbf16>
    %cst_8 = arith.constant dense<0.000000e+00> : vector<2x128xf32>
    %11 = tpu.matmul %9, %10, %cst_8 {dimension_numbers = #tpu.dot_dimension_numbers<[1], [0], [0], [1], [0, 0, 1, 1], [], []>} : vector<2x192xbf16>, vector<192x128xbf16>, vector<2x128xf32> -> vector<2x128xf32>
    %c0_9 = arith.constant 0 : index
    %c0_10 = arith.constant 0 : index
    %12 = vector.load %arg5[%c0_9, %c0_10] : memref<1x128xf32, #tpu.memory_space<vmem>>, vector<1x128xf32>
    %13 = vector.broadcast %12 : vector<1x128xf32> to vector<2x128xf32>
    %14 = arith.addf %11, %13 : vector<2x128xf32>
    %cst_11 = arith.constant 0.000000e+00 : f32
    %15 = vector.broadcast %cst_11 : f32 to vector<2x128xf32>
    %16 = arith.maximumf %14, %15 : vector<2x128xf32>
    %17 = arith.truncf %16 : vector<2x128xf32> to vector<2x128xbf16>
    %c0_12 = arith.constant 0 : index
    %c0_13 = arith.constant 0 : index
    %18 = vector.load %arg6[%c0_12, %c0_13] : memref<128x64xbf16, #tpu.memory_space<vmem>>, vector<128x64xbf16>
    %cst_14 = arith.constant dense<0.000000e+00> : vector<2x64xf32>
    %19 = tpu.matmul %17, %18, %cst_14 {dimension_numbers = #tpu.dot_dimension_numbers<[1], [0], [0], [1], [0, 0, 1, 1], [], []>} : vector<2x128xbf16>, vector<128x64xbf16>, vector<2x64xf32> -> vector<2x64xf32>
    %c0_15 = arith.constant 0 : index
    %c0_16 = arith.constant 0 : index
    %20 = vector.load %arg7[%c0_15, %c0_16] : memref<1x64xf32, #tpu.memory_space<vmem>>, vector<1x64xf32>
    %21 = vector.broadcast %20 : vector<1x64xf32> to vector<2x64xf32>
    %22 = arith.addf %19, %21 : vector<2x64xf32>
    %23 = arith.negf %22 : vector<2x64xf32>
    %24 = math.exp %23 : vector<2x64xf32>
    %cst_17 = arith.constant 1.000000e+00 : f32
    %25 = vector.broadcast %cst_17 : f32 to vector<2x64xf32>
    %26 = arith.addf %25, %24 : vector<2x64xf32>
    %27 = arith.divf %25, %26 : vector<2x64xf32>
    %c0_18 = arith.constant 0 : index
    %c0_19 = arith.constant 0 : index
    %28 = vector.load %arg8[%c0_18, %c0_19] : memref<2x64xf32, #tpu.memory_space<vmem>>, vector<2x64xf32>
    tpu.vector_store %arg8[%c0_18, %c0_19], %27 {strides = array<i32>} : memref<2x64xf32, #tpu.memory_space<vmem>>, vector<2x64xf32>,
    return
  }
  func.func @transform_0(%arg0: i32) -> (i32, i32) {
    %c0_i32 = arith.constant 0 : i32
    %c0_i32_0 = arith.constant 0 : i32
    return %arg0, %c0_i32 : i32, i32
  }
  func.func @transform_1(%arg0: i32) -> (i32, i32) {
    %c0_i32 = arith.constant 0 : i32
    %c0_i32_0 = arith.constant 0 : i32
    %c0_i32_1 = arith.constant 0 : i32
    return %c0_i32, %c0_i32_0 : i32, i32
  }
  func.func @transform_2(%arg0: i32) -> (i32, i32) {
    %c0_i32 = arith.constant 0 : i32
    %c0_i32_0 = arith.constant 0 : i32
    %c0_i32_1 = arith.constant 0 : i32
    return %c0_i32, %c0_i32_0 : i32, i32
  }
  func.func @transform_3(%arg0: i32) -> (i32, i32) {
    %c0_i32 = arith.constant 0 : i32
    %c0_i32_0 = arith.constant 0 : i32
    %c0_i32_1 = arith.constant 0 : i32
    return %c0_i32, %c0_i32_0 : i32, i32
  }
  func.func @transform_4(%arg0: i32) -> (i32, i32) {
    %c0_i32 = arith.constant 0 : i32
    %c0_i32_0 = arith.constant 0 : i32
    %c0_i32_1 = arith.constant 0 : i32
    return %c0_i32, %c0_i32_0 : i32, i32
  }
  func.func @transform_5(%arg0: i32) -> (i32, i32) {
    %c0_i32 = arith.constant 0 : i32
    %c0_i32_0 = arith.constant 0 : i32
    %c0_i32_1 = arith.constant 0 : i32
    return %c0_i32, %c0_i32_0 : i32, i32
  }
  func.func @transform_6(%arg0: i32) -> (i32, i32) {
    %c0_i32 = arith.constant 0 : i32
    %c0_i32_0 = arith.constant 0 : i32
    %c0_i32_1 = arith.constant 0 : i32
    return %c0_i32, %c0_i32_0 : i32, i32
  }
  func.func @transform_7(%arg0: i32) -> (i32, i32) {
    %c0_i32 = arith.constant 0 : i32
    %c0_i32_0 = arith.constant 0 : i32
    return %arg0, %c0_i32 : i32, i32
  }
}

</mosaic_0001>

<bundles_post_ra>
// kernel: autoencoder_in_forward.1
= control target key start
LH: loop header
LB: loop body
LE: loop exit
PB: predicated region body
PF: predicated region fallthrough
CT: control target
= control target key end

     0   :  { %v723_v1 = vmov 0   ;;  %v724_v49 = vmov 0.0   ;;  %v75_v50 = vlaneseq  ;;  %vm393_vm0 = vcmask 523264   ;;  %s955_s1 = inlined_call_operand.vmem [shape: bf16[256,192], index: 1, kind: input, shape index: {}]   ;;  %s956_s0 = inlined_call_operand.vmem [shape: f32[2,256], index: 0, kind: input, shape index: {}]   ;;  %s957_s3 = inlined_call_operand.vmem [shape: bf16[192,128], index: 3, kind: input, shape index: {}]   ;;  %s958_s5 = inlined_call_operand.vmem [shape: bf16[128,64], index: 5, kind: input, shape index: {}]   ;;  %s959_s2 = inlined_call_operand.vmem [shape: f32[1,192], index: 2, kind: input, shape index: {}]   ;;  %s960_s4 = inlined_call_operand.vmem [shape: f32[1,128], index: 4, kind: input, shape index: {}]   ;;  %s961_s6 = inlined_call_operand.vmem [shape: f32[1,64], index: 6, kind: input, shape index: {}]   ;;  %s962_s7 = inlined_call_operand.vmem [shape: f32[2,64], index: 7, kind: output, shape index: {}]  }
   0x1   :  { %v651_v0 = vld [vmem:[%s955_s1 + $0x4] ss:$8 sps:$4 sm:$0xff]   ;;  %397 = vmatprep.subr.bf16.mxu1 %v723_v1  ;;  %v653_v2 = vld [vmem:[%s955_s1] ss:$8 sps:$4 sm:$0xff]   ;;  %v654_v3 = vld [vmem:[%s955_s1 + $0x14] ss:$8 sps:$4 sm:$0xff]  }
   0x2   :  { %245 = vmatprep.subr.bf16.mxu0 %v651_v0  ;;  %v656_v4 = vld [vmem:[%s955_s1 + $0x10] ss:$8 sps:$4 sm:$0xff]   ;;  %v657_v5 = vld [vmem:[%s955_s1 + $0x24] ss:$8 sps:$4 sm:$0xff]   ;;  %v659_v6 = vld [vmem:[%s955_s1 + $0x20] ss:$8 sps:$4 sm:$0xff]  }
   0x3   :  { %246 = vmatpush1.bf16.msra.mxu0 %v653_v2  ;;  %v660_v7 = vld [vmem:[%s955_s1 + $0x34] ss:$8 sps:$4 sm:$0xff]   ;;  %v662_v8 = vld [vmem:[%s955_s1 + $0x30] ss:$8 sps:$4 sm:$0xff]   ;;  %v663_v9 = vld [vmem:[%s955_s1 + $0x44] ss:$8 sps:$4 sm:$0xff]  }
   0x4   :  { %247 = vmatprep.subr.bf16.mxu0 %v654_v3  ;;  %v665_v10 = vld [vmem:[%s955_s1 + $0x40] ss:$8 sps:$4 sm:$0xff]   ;;  %v666_v11 = vld [vmem:[%s955_s1 + $0x54] ss:$8 sps:$4 sm:$0xff]   ;;  %v668_v12 = vld [vmem:[%s955_s1 + $0x50] ss:$8 sps:$4 sm:$0xff]  }
   0x5   :  { %v669_v13 = vld [vmem:[%s955_s1 + $0x64] ss:$8 sps:$4 sm:$0xff]   ;;  %v671_v14 = vld [vmem:[%s955_s1 + $0x60] ss:$8 sps:$4 sm:$0xff]   ;;  %v672_v18 = vld [vmem:[%s955_s1 + $0x74] ss:$8 sps:$4 sm:$0xff]  }
   0x6   :  { %v812_v15 = vld.sshfl [vmem:[%s956_s0] sm:$0x33 pattern:$0x76325410]  ;;  %v700_v20 = vld [vmem:[%s957_s3 + $0x8] sm:$0xff]   ;;  %v701_v23 = vld [vmem:[%s957_s3 + $0x10] sm:$0xff]  }
   0x7   :  { %248 = vmatpush1.bf16.msra.mxu0 %v656_v4  ;;  %v36_v16 = vcombine.high %v812_v15, %v812_v15  ;;  %v699_v17 = vld [vmem:[%s957_s3] sm:$0xff]   ;;  %v674_v21 = vld [vmem:[%s955_s1 + $0x70] ss:$8 sps:$4 sm:$0xff]   ;;  %v678_v25 = vld [vmem:[%s955_s1 + $0x94] ss:$8 sps:$4 sm:$0xff]   ;;  %v39_v46 = vpack.c.bf16 %v812_v15, %v812_v15  ;;  %v76_v51 = vshrl.u32 %v75_v50, 7 }
   0x8   :  { %249 = vmatprep.subr.bf16.mxu0 %v657_v5  ;;  %398 = vmatpush1.bf16.msra.mxu1 %v699_v17  ;;  %v675_v22 = vld [vmem:[%s955_s1 + $0x84] ss:$8 sps:$4 sm:$0xff]   ;;  %v677_v24 = vld [vmem:[%s955_s1 + $0x80] ss:$8 sps:$4 sm:$0xff]   ;;  %v702_v26 = vld [vmem:[%s957_s3 + $0x18] sm:$0xff]   ;;  %vm725_vm1 = vmmov 0  }
   0x9   :  { %v40_v19 = vpack.c.bf16 %v36_v16, %v36_v16  ;;  %399 = vmatprep.subr.bf16.mxu1 %v723_v1  ;;  %v680_v27 = vld [vmem:[%s955_s1 + $0x90] ss:$8 sps:$4 sm:$0xff]   ;;  %v681_v28 = vld [vmem:[%s955_s1 + $0xa4] ss:$8 sps:$4 sm:$0xff]   ;;  %v683_v30 = vld [vmem:[%s955_s1 + $0xa0] ss:$8 sps:$4 sm:$0xff]  }
   0xa   :  { %v703_v29 = vld [vmem:[%s957_s3 + $0x20] sm:$0xff]   ;;  %v684_v31 = vld [vmem:[%s955_s1 + $0xb4] ss:$8 sps:$4 sm:$0xff]   ;;  %v704_v32 = vld [vmem:[%s957_s3 + $0x28] sm:$0xff]   ;;  %v77_v52 = vsub.s32 0, %v76_v51  ;;  %v81_v54 = vsub.s32 1, %v76_v51 }
   0xb   :  { %250 = vmatpush1.bf16.msra.mxu0 %v659_v6  ;;  %277 = vmatprep.mubr.bf16.mxu0 %v40_v19  ;;  %v686_v33 = vld [vmem:[%s955_s1 + $0xb0] ss:$8 sps:$4 sm:$0xff]   ;;  %v687_v34 = vld [vmem:[%s955_s1 + $0xc4] ss:$8 sps:$4 sm:$0xff]   ;;  %v689_v36 = vld [vmem:[%s955_s1 + $0xc0] ss:$8 sps:$4 sm:$0xff]  }
   0xc   :  { %251 = vmatprep.subr.bf16.mxu0 %v660_v7  ;;  %400 = vmatpush1.bf16.msra.mxu1 %v700_v20  ;;  %v705_v35 = vld [vmem:[%s957_s3 + $0x30] sm:$0xff]   ;;  %v706_v38 = vld [vmem:[%s957_s3 + $0x38] sm:$0xff]   ;;  %v693_v40 = vld [vmem:[%s955_s1 + $0xe4] ss:$8 sps:$4 sm:$0xff]   ;;  %vm556_vm2 = vcmask 517120  }
   0xd   :  { %401 = vmatprep.subr.bf16.mxu1 %v723_v1  ;;  %v690_v37 = vld [vmem:[%s955_s1 + $0xd4] ss:$8 sps:$4 sm:$0xff]   ;;  %v692_v39 = vld [vmem:[%s955_s1 + $0xd0] ss:$8 sps:$4 sm:$0xff]   ;;  %v707_v41 = vld [vmem:[%s957_s3 + $0x40] sm:$0xff]  }
   0xe   :  { %v695_v42 = vld [vmem:[%s955_s1 + $0xe0] ss:$8 sps:$4 sm:$0xff]   ;;  %v696_v43 = vld [vmem:[%s955_s1 + $0xf4] ss:$8 sps:$4 sm:$0xff]   ;;  %v698_v45 = vld [vmem:[%s955_s1 + $0xf0] ss:$8 sps:$4 sm:$0xff]  }
   0xf   :  { %252 = vmatpush1.bf16.msra.mxu0 %v662_v8  ;;  %v708_v44 = vld [vmem:[%s957_s3 + $0x48] sm:$0xff]   ;;  %v709_v47 = vld [vmem:[%s957_s3 + $0x50] sm:$0xff]   ;;  %v710_v48 = vld [vmem:[%s957_s3 + $0x58] sm:$0xff]  }
  0x10   :  { %253 = vmatprep.subr.bf16.mxu0 %v663_v9  ;;  %402 = vmatpush1.bf16.msra.mxu1 %v701_v23  ;;  %v73_v53 = vld [vmem:[%s959_s2] sm:$0x3]  ;;  %v712_v4 = vld [vmem:[%s958_s5 + $0x8] sm:$0xff]   ;;  %v713_v5 = vld [vmem:[%s958_s5 + $0x10] sm:$0xff]  }
  0x11   :  { %403 = vmatprep.subr.bf16.mxu1 %v723_v1  ;;  %v78_v55 = vrot.slane %v73_v53, %v77_v52  ;;  %v82_v56 = vrot.slane %v73_v53, %v81_v54  ;;  %v711_v2 = vld [vmem:[%s958_s5] sm:$0xff]   ;;  %v714_v6 = vld [vmem:[%s958_s5 + $0x18] sm:$0xff]   ;;  %v716_v8 = vld [vmem:[%s958_s5 + $0x28] sm:$0xff]  }
  0x12   :  { %v715_v7 = vld [vmem:[%s958_s5 + $0x20] sm:$0xff]   ;;  %v717_v9 = vld [vmem:[%s958_s5 + $0x30] sm:$0xff]  }
  0x13   :  { %254 = vmatpush1.bf16.msra.mxu0 %v665_v10  ;;  %v718_v10 = vld [vmem:[%s958_s5 + $0x38] sm:$0xff]   ;;  %v609_v19 = vld [vmem:[%s961_s6] ss:$0 sm:$0xff] }
  0x14   :  { %255 = vmatprep.subr.bf16.mxu0 %v666_v11  ;;  %404 = vmatpush1.bf16.msra.mxu1 %v702_v26  ;;  %v595_v11 = vld [vmem:[%s960_s4] ss:$0 sm:$0xff] }
  0x15   :  { %405 = vmatprep.subr.bf16.mxu1 %v723_v1 }
  0x17   :  { %256 = vmatpush1.bf16.msra.mxu0 %v668_v12 }
  0x18   :  { %257 = vmatprep.subr.bf16.mxu0 %v669_v13  ;;  %406 = vmatpush1.bf16.msra.mxu1 %v703_v29 }
  0x19   :  { %407 = vmatprep.subr.bf16.mxu1 %v723_v1 }
  0x1b   :  { %258 = vmatpush1.bf16.msra.mxu0 %v671_v14 }
  0x1c   :  { %259 = vmatprep.subr.bf16.mxu0 %v672_v18  ;;  %408 = vmatpush1.bf16.msra.mxu1 %v704_v32 }
  0x1d   :  { %409 = vmatprep.subr.bf16.mxu1 %v723_v1 }
  0x1f   :  { %260 = vmatpush1.bf16.msra.mxu0 %v674_v21 }
  0x20   :  { %261 = vmatprep.subr.bf16.mxu0 %v675_v22  ;;  %410 = vmatpush1.bf16.msra.mxu1 %v705_v35 }
  0x21   :  { %411 = vmatprep.subr.bf16.mxu1 %v723_v1 }
  0x23   :  { %262 = vmatpush1.bf16.msra.mxu0 %v677_v24 }
  0x24   :  { %263 = vmatprep.subr.bf16.mxu0 %v678_v25  ;;  %412 = vmatpush1.bf16.msra.mxu1 %v706_v38 }
  0x25   :  { %413 = vmatprep.subr.bf16.mxu1 %v723_v1 }
  0x27   :  { %264 = vmatpush1.bf16.msra.mxu0 %v680_v27 }
  0x28   :  { %265 = vmatprep.subr.bf16.mxu0 %v681_v28  ;;  %414 = vmatpush1.bf16.msra.mxu1 %v707_v41 }
  0x29   :  { %415 = vmatprep.subr.bf16.mxu1 %v723_v1 }
  0x2b   :  { %266 = vmatpush1.bf16.msra.mxu0 %v683_v30 }
  0x2c   :  { %267 = vmatprep.subr.bf16.mxu0 %v684_v31  ;;  %416 = vmatpush1.bf16.msra.mxu1 %v708_v44 }
  0x2d   :  { %417 = vmatprep.subr.bf16.mxu1 %v723_v1 }
  0x2f   :  { %268 = vmatpush1.bf16.msra.mxu0 %v686_v33 }
  0x30   :  { %269 = vmatprep.subr.bf16.mxu0 %v687_v34  ;;  %418 = vmatpush1.bf16.msra.mxu1 %v709_v47 }
  0x31   :  { %419 = vmatprep.subr.bf16.mxu1 %v723_v1 }
  0x33   :  { %270 = vmatpush1.bf16.msra.mxu0 %v689_v36 }
  0x34   :  { %271 = vmatprep.subr.bf16.mxu0 %v690_v37  ;;  %420 = vmatpush1.bf16.msra.mxu1 %v710_v48 }
  0x35   :  { %628 = vmatprep.subr.bf16.mxu1 %v724_v49 }
  0x37   :  { %272 = vmatpush1.bf16.msra.mxu0 %v692_v39 }
  0x38   :  { %273 = vmatprep.subr.bf16.mxu0 %v693_v40 }
  0x3b   :  { %274 = vmatpush1.bf16.msra.mxu0 %v695_v42 }
  0x3c   :  { %275 = vmatprep.subr.bf16.mxu0 %v696_v43 }
  0x3f   :  { %276 = vmatpush1.bf16.msra.mxu0 %v698_v45 }
  0x42   :  { %278 = vmatmul.mubr.bf16.vlgmr.msra.gmra.mrb[0].mxu0 %v39_v46 }
 0x115   :  { %v279_v57 = vpop.f32.mrb[0].mxu0 }
 0x116   :  { %v280_v58 = vadd.f32 %v279_v57, %v78_v55  ;;  %v281_v59 = vpop.f32.mrb[1].mxu0 }
 0x117   :  { %v282_v60 = vadd.f32 %v281_v59, %v82_v56  ;;  %v283_v61 = vpop.f32.mrb[2].mxu0 }
 0x118   :  { %v286_v62 = vmax.f32 %v280_v58, 0.0  ;;  %v284_v63 = vpop.f32.mrb[3].mxu0 }
 0x119   :  { %v287_v0 = vmax.f32 %v282_v60, 0.0 }
 0x11a   :  { %v288_v3 = vpack.c.bf16 %v286_v62, %v286_v62 }
 0x11b   :  { %v289_v1 = vpack.c.bf16 %v287_v0, %v287_v0 }
 0x11d   :  { %608 = vmatprep.mubr.msk.bf16.mxu1 %vm393_vm0, %v289_v1 }
 0x11e   :  { %430 = vmatmul.mubr.bf16.vlgmr.msra.gmra.mrb[0].mxu1 %v288_v3 }
 0x11f   :  { %629 = vmatpush3.bf16.msra.mxu1 %v711_v2  ;;  %644 = vmatprep.mubr.msk.bf16.mxu1 %vm725_vm1, %v724_v49 }
 0x120   :  { %630 = vmatprep.subr.bf16.mxu1 %v724_v49 }
 0x123   :  { %631 = vmatpush3.bf16.msra.mxu1 %v712_v4 }
 0x124   :  { %632 = vmatprep.subr.bf16.mxu1 %v724_v49 }
 0x127   :  { %633 = vmatpush3.bf16.msra.mxu1 %v713_v5 }
 0x128   :  { %634 = vmatprep.subr.bf16.mxu1 %v724_v49 }
 0x12b   :  { %635 = vmatpush3.bf16.msra.mxu1 %v714_v6 }
 0x12c   :  { %636 = vmatprep.subr.bf16.mxu1 %v724_v49 }
 0x12f   :  { %637 = vmatpush3.bf16.msra.mxu1 %v715_v7 }
 0x130   :  { %638 = vmatprep.subr.bf16.mxu1 %v724_v49 }
 0x133   :  { %639 = vmatpush3.bf16.msra.mxu1 %v716_v8 }
 0x134   :  { %640 = vmatprep.subr.bf16.mxu1 %v724_v49 }
 0x137   :  { %641 = vmatpush3.bf16.msra.mxu1 %v717_v9 }
 0x138   :  { %642 = vmatprep.subr.bf16.mxu1 %v724_v49 }
 0x13b   :  { %643 = vmatpush3.bf16.msra.mxu1 %v718_v10 }
 0x1f1   :  { %v431_v12 = vpop.f32.mrb[0].mxu1 }
 0x1f2   :  { %v432_v13 = vadd.f32 %v595_v11, %v431_v12  ;;  %v433_v14 = vpop.f32.mrb[1].mxu1 }
 0x1f3   :  { %v434_v15 = vpop.f32.mrb[2].mxu1 }
 0x1f4   :  { %v437_v16 = vmax.f32 %v432_v13, 0.0  ;;  %v435_v17 = vpop.f32.mrb[3].mxu1 }
 0x1f6   :  { %v438_v18 = vpack.c.bf16 %v437_v16, %v437_v16 }
 0x1f8   :  { %645 = vmatmul.mubr.bf16.vlgmr.msra.gmra.mrb[4].mxu1 %v438_v18 }
 0x2cb   :  { %v544_v20 = vpop.f32.mrb[4].mxu1 }
 0x2cc   :  { %v545_v21 = vadd.f32 %v609_v19, %v544_v20  ;;  %v646_v22 = vpop.f32.mrb[5].mxu1 }
 0x2cd   :  { %v547_v23 = vpop.f32.mrb[6].mxu1 }
 0x2ce   :  { %v618_v24 = vmul.f32 -1.442695, %v545_v21  ;;  %v647_v25 = vpop.f32.mrb[7].mxu1 }
 0x2d0   :  { %719 = vpow2.f32 %v618_v24 }
 0x2da   :  { %v720_v26 = vpop.eup %719 }
 0x2db   :  { %v553_v27 = vadd.f32 1.0, %v720_v26 }
 0x2dd   :  { %721 = vrcp.f32 %v553_v27 }
 0x2e7   :  { %v722_v28 = vpop.eup %721 }
 0x2e8   :  { %557 = vst.msk [vmem:[%s962_s7] sm:$0x3] %vm556_vm2, %v722_v28 }

</bundles_post_ra>
